<compile_context>
chip_gen: v7x
topology: tpu7x:2x2x1
jax: 0.10.0
libtpu: 0.0.40
codegen_flags: <defaults>
</compile_context>

<pallas_src>
import functools

import jax
import jax.numpy as jnp
from jax.experimental import pallas as pl
from jax.experimental.pallas import tpu as pltpu


def _mean_pool_kernel(ids_ref, x_ref, o_ref, acc_ref, cnt_ref, *,
                      pad_token_id, seq_len, s_chunk, ragged):
    # ids_ref: (b_tile, s_chunk, 1) int32
    # x_ref:   (b_tile, s_chunk, H)
    # o_ref:   (1, b_tile, H)
    # acc_ref: (b_tile, H) f32 scratch  (running masked sum over S)
    # cnt_ref: (b_tile, 1) f32 scratch  (running non-pad token count)
    k = pl.program_id(1)

    @pl.when(k == 0)
    def _init():
        acc_ref[...] = jnp.zeros_like(acc_ref)
        cnt_ref[...] = jnp.zeros_like(cnt_ref)

    mask = ids_ref[...] != pad_token_id                    # (b_tile, s_chunk, 1) bool
    if ragged:
        # Mask out rows past the true sequence length in the last (partial) chunk.
        pos = jax.lax.broadcasted_iota(jnp.int32, mask.shape, 1) + k * s_chunk
        mask = jnp.logical_and(mask, pos < seq_len)

    x = x_ref[...]
    # Mask in native dtype; upcast only inside the accumulation.
    masked_x = jnp.where(mask, x, jnp.zeros((), x.dtype))  # (b_tile, s_chunk, H)

    acc_ref[...] += jnp.sum(masked_x, axis=1, dtype=jnp.float32)  # (b_tile, H)
    cnt_ref[...] += jnp.sum(mask, axis=1, dtype=jnp.float32)      # (b_tile, 1)

    @pl.when(k == pl.num_programs(1) - 1)
    def _finalize():
        # Exact divide (matches torch). All-padding rows give inf/nan, same as
        # the PyTorch reference (documented, intentional).
        o_ref[0, :, :] = (acc_ref[...] / cnt_ref[...]).astype(o_ref.dtype)


def _pick_batch_tile(B, H):
    """Largest divisor of B that respects vreg pressure and keeps >=2 batch steps."""
    lane_groups = max(1, pl.cdiv(H, 128))
    vreg_cap = max(1, 32 // lane_groups)          # b_tile * ceil(H/128) <= 32
    cap = min(8, B, vreg_cap)
    # Prefer >= 2 batch-grid steps so ("parallel", ...) can use both v7x TCs.
    for d in range(cap, 0, -1):
        if B % d == 0 and B // d >= 2:
            return d
    for d in range(cap, 0, -1):
        if B % d == 0:
            return d
    return 1


def _pick_seq_chunk_and_vmem(S, b_tile, H, itemsize):
    """Sequence chunk + explicit VMEM limit from the real footprint."""
    try:
        phys = int(pltpu.get_tpu_info().vmem_capacity_bytes)
    except Exception:
        phys = 64 * 1024 * 1024                   # v7x per-core size: safe lower bound

    total_budget = min(int(phys * 0.55), 72 * 1024 * 1024)

    # Per-sequence-row bytes of the double-buffered streaming working set.
    x_row = b_tile * H * itemsize
    ids_row = b_tile * 128 * 4                    # (.., 1) int32 lane-pads to 128 lanes
    per_row = 2 * (x_row + ids_row)               # x2 for double buffering

    # Resident scratch + double-buffered output block + fixed headroom.
    fixed = (8 * ((b_tile + 7) // 8) * H * 4      # acc scratch (sublane padded)
             + 8 * 128 * 4                        # count scratch
             + 2 * b_tile * H * itemsize          # output double buffer
             + 2 * 1024 * 1024)                   # compiler-internal headroom

    avail = max(total_budget - fixed, per_row * 8)
    max_rows = max(avail // per_row, 8)
    # Keep each x buffer <= ~16 MiB (pipeline sweet spot; avoids huge steps).
    max_rows = min(max_rows, max((16 * 1024 * 1024) // max(x_row, 1), 8))

    if max_rows >= S:
        s_chunk = S                               # full-extent block always legal
    else:
        s_chunk = max(8, (int(max_rows) // 8) * 8)  # multiple of 8 (< S)

    need = 2 * s_chunk * (x_row + ids_row) + fixed
    vmem_limit = int(min(phys, max(need + need // 4, 16 * 1024 * 1024)))
    return s_chunk, vmem_limit


def mean_pooling(x, input_token_ids, pad_token_id=0):
    """Masked mean pooling over the sequence axis.

    x:               (B, S, H) float array
    input_token_ids: (B, S)    int array
    returns:         (B, 1, H) same dtype as x
    """
    B, S, H = x.shape
    itemsize = jnp.dtype(x.dtype).itemsize

    b_tile = _pick_batch_tile(B, H)
    s_chunk, vmem_limit = _pick_seq_chunk_and_vmem(S, b_tile, H, itemsize)
    n_b = B // b_tile
    n_k = pl.cdiv(S, s_chunk)
    ragged = (S % s_chunk) != 0

    # Trailing singleton axis so the mask has S on sublanes (same as x's S axis).
    ids3 = input_token_ids.astype(jnp.int32).reshape(B, S, 1)

    kernel = functools.partial(
        _mean_pool_kernel,
        pad_token_id=pad_token_id, seq_len=S, s_chunk=s_chunk, ragged=ragged)

    cost = pl.CostEstimate(
        flops=2 * B * S * H,
        transcendentals=0,
        bytes_accessed=B * S * H * itemsize + B * S * 4 + B * H * itemsize,
    )

    out = pl.pallas_call(
        kernel,
        out_shape=jax.ShapeDtypeStruct((n_b, b_tile, H), x.dtype),
        grid_spec=pltpu.PrefetchScalarGridSpec(
            num_scalar_prefetch=0,
            grid=(n_b, n_k),
            in_specs=[
                pl.BlockSpec((b_tile, s_chunk, 1), lambda b, k: (b, k, 0)),  # ids
                pl.BlockSpec((b_tile, s_chunk, H), lambda b, k: (b, k, 0)),  # x
            ],
            out_specs=pl.BlockSpec((1, b_tile, H), lambda b, k: (b, 0, 0)),
            scratch_shapes=[
                pltpu.VMEM((b_tile, H), jnp.float32),  # acc
                pltpu.VMEM((b_tile, 1), jnp.float32),  # token count
            ],
        ),
        compiler_params=pltpu.CompilerParams(
            dimension_semantics=("parallel", "arbitrary"),
            vmem_limit_bytes=vmem_limit,
        ),
        cost_estimate=cost,
    )(ids3, x)

    return out.reshape(B, 1, H)


def _reference(x, input_token_ids, pad_token_id=0):
    mask = (input_token_ids != pad_token_id).astype(jnp.float32)        # (B, S)
    mean_mask = mask / jnp.sum(mask, axis=1, keepdims=True)             # (B, S)
    return jnp.sum(x * mean_mask[:, :, None], axis=1, keepdims=True)    # (B, 1, H)


if __name__ == "__main__":
    key = jax.random.PRNGKey(0)
    B, S, H = 2, 8, 32
    pad_token_id = 0

    kx, kid = jax.random.split(key)
    x = jax.random.normal(kx, (B, S, H), dtype=jnp.float32)

    # Deterministic token ids with some padding (== pad_token_id) at the tail.
    ids = jax.random.randint(kid, (B, S), minval=1, maxval=100, dtype=jnp.int32)
    ids = ids.at[0, 6:].set(pad_token_id)   # batch 0: 2 pad tokens
    ids = ids.at[1, 3:].set(pad_token_id)   # batch 1: 5 pad tokens

    out = mean_pooling(x, ids, pad_token_id)
    out = jax.block_until_ready(out)

    ref = _reference(x, ids, pad_token_id)
    assert out.shape == (B, 1, H), out.shape
    assert jnp.allclose(out, ref, atol=1e-5, rtol=1e-5), "mismatch vs reference"

    print("KERNEL_OK")
</pallas_src>

<mosaic_0001>
module attributes {stable_mosaic.version = 11 : i64} {
  func.func @_mean_pool_kernel(%arg0: i32, %arg1: i32, %arg2: memref<1x8x1xi32, #tpu.memory_space<vmem>>, %arg3: memref<1x8x32xf32, #tpu.memory_space<vmem>>, %arg4: memref<1x1x32xf32, #tpu.memory_space<vmem>>, %arg5: memref<1x32xf32, #tpu.memory_space<vmem>>, %arg6: memref<1x1xf32, #tpu.memory_space<vmem>>) attributes {dimension_semantics = [#tpu.dimension_semantics<parallel>, #tpu.dimension_semantics<arbitrary>], iteration_bounds = array<i64: 2, 1>, scalar_prefetch = 0 : i64, scratch_operands = 2 : i64, tpu.core_type = #tpu.core_type<tc>, window_params = [{transform_indices = @transform_0, window_bounds = array<i64: 1, 8, 1>}, {transform_indices = @transform_1, window_bounds = array<i64: 1, 8, 32>}, {transform_indices = @transform_2, window_bounds = array<i64: 1, 1, 32>}]} {
    %c0_i32 = arith.constant 0 : i32
    %0 = arith.cmpi eq, %arg1, %c0_i32 : i32
    %1 = arith.extui %0 : i1 to i32
    %c0_i32_0 = arith.constant 0 : i32
    %2 = arith.cmpi ne, %1, %c0_i32_0 : i32
    scf.if %2 {
      %cst_19 = arith.constant 0.000000e+00 : f32
      %24 = vector.broadcast %cst_19 : f32 to vector<1x32xf32>
      %c0_20 = arith.constant 0 : index
      %c0_21 = arith.constant 0 : index
      %25 = vector.load %arg5[%c0_20, %c0_21] : memref<1x32xf32, #tpu.memory_space<vmem>>, vector<1x32xf32>
      tpu.vector_store %arg5[%c0_20, %c0_21], %24 {strides = array<i32>} : memref<1x32xf32, #tpu.memory_space<vmem>>, vector<1x32xf32>,
      %cst_22 = arith.constant 0.000000e+00 : f32
      %26 = vector.broadcast %cst_22 : f32 to vector<1x1xf32>
      %c0_23 = arith.constant 0 : index
      %c0_24 = arith.constant 0 : index
      %27 = vector.load %arg6[%c0_23, %c0_24] : memref<1x1xf32, #tpu.memory_space<vmem>>, vector<1x1xf32>
      tpu.vector_store %arg6[%c0_23, %c0_24], %26 {strides = array<i32>} : memref<1x1xf32, #tpu.memory_space<vmem>>, vector<1x1xf32>,
    } else {
    }
    %c0 = arith.constant 0 : index
    %c0_1 = arith.constant 0 : index
    %c0_2 = arith.constant 0 : index
    %3 = vector.load %arg2[%c0, %c0_1, %c0_2] : memref<1x8x1xi32, #tpu.memory_space<vmem>>, vector<1x8x1xi32>
    %c0_i32_3 = arith.constant 0 : i32
    %4 = vector.broadcast %c0_i32_3 : i32 to vector<1x8x1xi32>
    %5 = arith.cmpi ne, %3, %4 : vector<1x8x1xi32>
    %c0_4 = arith.constant 0 : index
    %c0_5 = arith.constant 0 : index
    %c0_6 = arith.constant 0 : index
    %6 = vector.load %arg3[%c0_4, %c0_5, %c0_6] : memref<1x8x32xf32, #tpu.memory_space<vmem>>, vector<1x8x32xf32>
    %cst = arith.constant 0.000000e+00 : f32
    %7 = vector.shape_cast %5 : vector<1x8x1xi1> to vector<1x8x1xi1>
    %8 = vector.broadcast %7 : vector<1x8x1xi1> to vector<1x8x32xi1>
    %9 = vector.broadcast %cst : f32 to vector<1x8x32xf32>
    %10 = arith.select %8, %6, %9 : vector<1x8x32xi1>, vector<1x8x32xf32>
    %c0_7 = arith.constant 0 : index
    %c0_8 = arith.constant 0 : index
    %11 = vector.load %arg5[%c0_7, %c0_8] : memref<1x32xf32, #tpu.memory_space<vmem>>, vector<1x32xf32>
    %cst_9 = arith.constant dense<0.000000e+00> : vector<1x32xf32>
    %12 = vector.multi_reduction <add>, %10, %cst_9 [1] : vector<1x8x32xf32> to vector<1x32xf32>
    %13 = arith.addf %11, %12 : vector<1x32xf32>
    %c0_10 = arith.constant 0 : index
    %c0_11 = arith.constant 0 : index
    %14 = vector.load %arg5[%c0_10, %c0_11] : memref<1x32xf32, #tpu.memory_space<vmem>>, vector<1x32xf32>
    tpu.vector_store %arg5[%c0_10, %c0_11], %13 {strides = array<i32>} : memref<1x32xf32, #tpu.memory_space<vmem>>, vector<1x32xf32>,
    %c0_12 = arith.constant 0 : index
    %c0_13 = arith.constant 0 : index
    %15 = vector.load %arg6[%c0_12, %c0_13] : memref<1x1xf32, #tpu.memory_space<vmem>>, vector<1x1xf32>
    %16 = arith.extui %5 : vector<1x8x1xi1> to vector<1x8x1xi32>
    %17 = arith.sitofp %16 : vector<1x8x1xi32> to vector<1x8x1xf32>
    %cst_14 = arith.constant dense<0.000000e+00> : vector<1x1xf32>
    %18 = vector.multi_reduction <add>, %17, %cst_14 [1] : vector<1x8x1xf32> to vector<1x1xf32>
    %19 = arith.addf %15, %18 : vector<1x1xf32>
    %c0_15 = arith.constant 0 : index
    %c0_16 = arith.constant 0 : index
    %20 = vector.load %arg6[%c0_15, %c0_16] : memref<1x1xf32, #tpu.memory_space<vmem>>, vector<1x1xf32>
    tpu.vector_store %arg6[%c0_15, %c0_16], %19 {strides = array<i32>} : memref<1x1xf32, #tpu.memory_space<vmem>>, vector<1x1xf32>,
    %c0_i32_17 = arith.constant 0 : i32
    %21 = arith.cmpi eq, %arg1, %c0_i32_17 : i32
    %22 = arith.extui %21 : i1 to i32
    %c0_i32_18 = arith.constant 0 : i32
    %23 = arith.cmpi ne, %22, %c0_i32_18 : i32
    scf.if %23 {
      %c0_19 = arith.constant 0 : index
      %c0_20 = arith.constant 0 : index
      %24 = vector.load %arg5[%c0_19, %c0_20] : memref<1x32xf32, #tpu.memory_space<vmem>>, vector<1x32xf32>
      %c0_21 = arith.constant 0 : index
      %c0_22 = arith.constant 0 : index
      %25 = vector.load %arg6[%c0_21, %c0_22] : memref<1x1xf32, #tpu.memory_space<vmem>>, vector<1x1xf32>
      %26 = vector.broadcast %25 : vector<1x1xf32> to vector<1x32xf32>
      %27 = arith.divf %24, %26 : vector<1x32xf32>
      %c0_23 = arith.constant 0 : index
      %c0_24 = arith.constant 0 : index
      %c0_25 = arith.constant 0 : index
      %28 = vector.load %arg4[%c0_23, %c0_24, %c0_25] : memref<1x1x32xf32, #tpu.memory_space<vmem>>, vector<1x1x32xf32>
      %29 = vector.shape_cast %28 : vector<1x1x32xf32> to vector<1x32xf32>
      %30 = vector.shape_cast %27 : vector<1x32xf32> to vector<1x1x32xf32>
      tpu.vector_store %arg4[%c0_23, %c0_24, %c0_25], %30 {strides = array<i32>} : memref<1x1x32xf32, #tpu.memory_space<vmem>>, vector<1x1x32xf32>,
    } else {
    }
    return
  }
  func.func @transform_0(%arg0: i32, %arg1: i32) -> (i32, i32, i32) {
    %c0_i32 = arith.constant 0 : i32
    %c0_i32_0 = arith.constant 0 : i32
    return %arg0, %arg1, %c0_i32 : i32, i32, i32
  }
  func.func @transform_1(%arg0: i32, %arg1: i32) -> (i32, i32, i32) {
    %c0_i32 = arith.constant 0 : i32
    %c0_i32_0 = arith.constant 0 : i32
    return %arg0, %arg1, %c0_i32 : i32, i32, i32
  }
  func.func @transform_2(%arg0: i32, %arg1: i32) -> (i32, i32, i32) {
    %c0_i32 = arith.constant 0 : i32
    %c0_i32_0 = arith.constant 0 : i32
    %c0_i32_1 = arith.constant 0 : i32
    return %arg0, %c0_i32, %c0_i32_0 : i32, i32, i32
  }
}

</mosaic_0001>

<bundles_post_ra>
// kernel: tpu_custom_call.1
= control target key start
LH: loop header
LB: loop body
LE: loop exit
PB: predicated region body
PF: predicated region fallthrough
CT: control target
= control target key end

     0   :  { %7 = vsyncpa [#allocation5], 0  ;;  %s631_s0 = inlined_call_operand.vmem [shape: s32[2,8,1], index: 0, kind: input, shape index: {}]   ;;  %s632_s1 = inlined_call_operand.vmem [shape: f32[2,8,32], index: 1, kind: input, shape index: {}]   ;;  %s633_s2 = inlined_call_operand.hbm [shape: f32[2,1,32], index: 2, kind: output, shape index: {}]  }
   0x1   :  { %9 = vsyncpa [#allocation5 + $0x1], 0  ;;  %s511_s9 = smov 0   ;;  %s513_s10 = smov 0  }
   0x2   :  { %s515_s11 = smov 0   ;;  %s517_s12 = smov 0  }
   0x3   :  { %s519_s13 = smov 0   ;;  %s521_s14 = smov 0  }
   0x4 LB: > { %s342_s15 = sadd.s32 4294967295, %s491_s14   ;;  %s343_s16 = sadd.s32 4294967294, %s491_s14   ;;  %s491_s14 = sphi %s521_s14, %s15_s14   ;;  %s487_s13 = sphi %s519_s13, %s640_s13   ;;  %s483_s12 = sphi %s517_s12, %s639_s12   ;;  %s479_s11 = sphi %s515_s11, %s638_s11   ;;  %s475_s10 = sphi %s513_s10, %s637_s10   ;;  %s471_s9 = sphi %s511_s9, %s636_s9  }
   0x5   : > { %s27_s17 = sadd.s32 1, %s487_s13  ;;  %s90_s18 = sadd.s32 1, %s479_s11 }
   0x6   : > { %p29_p0 = scmp.ge.s32.totalorder %s27_s17, 2  ;;  %p100_p1 = scmp.ne.s32.totalorder %s479_s11, %s475_s10 }
   0x7   : > { %p101_p2 = scmp.eq.s32.totalorder %s342_s15, 1  ;;  %p106_p3 = scmp.ne.s32.totalorder %s475_s10, %s471_s9 }
   0x8   : > { %s642_s17 = smov (%p29_p0, %s27_s17), 0  ;;  %p107_p5 = scmp.eq.s32.totalorder %s343_s16, 1 }
   0x9   : > { %p551_p4 = por %p101_p2, %p100_p1  ;;  %s87_s20 = ssub.s32 %s487_s13, %s642_s17 }
   0xa   : > { %p346_p6 = scmp.ge.s32.totalorder %s491_s14, 1  ;;  %p88_p7 = scmp.eq.s32.totalorder %s87_s20, 0 }
   0xb   : > { %p558_p8 = por %p107_p5, %p106_p3  ;;  %p145_p9 = scmp.lt.s32.totalorder %s491_s14, 3 }
   0xc   : > { %s564_s22 = scalar_select %p88_p7, %s479_s11, %s90_s18  }
   0xd   : > { %p146_p10 = pnand %p346_p6, %p145_p9 }
   0xe   : > { %p175_p11 = scmp.lt.s32.totalorder (!%p146_p10), %s483_s12, 1  ;;  %vm195_vm0 = vcmask (!%p146_p10), 0   ;;  %v493_v0 = vmov (!%p146_p10), 0   ;;  %v494_v1 = vmov (!%p146_p10), 0.0   ;;  %vm220_vm1 = vcmask (!%p146_p10), 7168   ;;  %s173_s3 = sand.u32 (!%p146_p10), 1, %s475_s10  }
   0xf   : > { %149 = sbr.rel (%p146_p10) target bundleno = 209 (0xd1), region = 28  ;;  %410 = vset.pattern.permute.xlu0 (!%p146_p10), %v493_v0  ;;  %196 = vst.msk [vmem:[#allocation3] sm:$0x1] (!%p146_p10), %vm195_vm0, %v494_v1  ;;  %vm193_vm3 = vcmask (!%p146_p10), 253952   ;;  %vm207_vm4 = vcmask (!%p146_p10), 261120   ;;  %v241_v24 = vlaneseq (!%p146_p10)  ;;  %s350_s4 = sshll.u32 (!%p146_p10), %s483_s12, 4 }
  0x10   : > { %194 = vst.msk [vmem:[#allocation2] sm:$0x1] (!%p146_p10), %vm193_vm3, %v494_v1  ;;  %s174_s5 = scalar_lea.vmem (!%p146_p10), [#allocation4], %s173_s3  ;;  %s583_s15 = scalar_lea.hbm (!%p146_p10), %s633_s2, %s350_s4 }
  0x11   : > { %v242_v27 = vshrl.u32 (!%p146_p10), %v241_v24, 7  ;;  %s261_s6 = sshll.u32 (!%p146_p10), %s174_s5, 4  ;;  %s249_s16 = scalar_lea.sflag (!%p146_p10), [#allocation5], %s173_s3  ;;  %s585_s6 = int_to_ptr.vmem [resolvable:$true] %s261_s6 }
  0x12   : > { %s413_s18 = scalar_lea.vmem (!%p146_p10), %s585_s6, 16 }
  0x13   : > { %v243_v29 = vsub.s32 (!%p146_p10), 0, %v242_v27  ;;  %p414_p12 = scmp.ne.s32.totalorder (!%p146_p10), %s585_s6, %s413_s18 }
  0x15   : > { %p415_p13 = pnand (!%p146_p10), %p414_p12, %p551_p4 }
  0x16   : > { %s176_s23 = scalar_select %p175_p11, %s483_s12, 1  ;;  %v218_v11 = vld [vmem:[#allocation3] sm:$0x1] }
  0x17   : > { %v206_v25 = vld [vmem:[#allocation2] sm:$0x1]  ;;  %p416_p0 = pneg %p415_p13  ;;  %s495_s12 = smov [#allocation4]  }
  0x18   : > { %s347_s24 = sshll.u32 %s176_s23, 3  ;;  %s417_s20 = sshll.u32 %s495_s12, 4  ;;  %s418_s20 = int_to_ptr.vmem [resolvable:$false] %s417_s20 }
  0x19   : > { %s181_s27 = scalar_lea.vmem %s631_s0, %s347_s24  ;;  %s188_s30 = scalar_lea.vmem %s632_s1, %s347_s24 }
  0x1a   : > { %v197_v2 = vld [vmem:[%s181_s27] sm:$0xff]  ;;  %s419_s23 = scalar_lea.vmem %s418_s20, 32  ;;  %p420_p1 = scmp.lt.s32.totalorder %s585_s6, %s418_s20 }
  0x1b   : > { %vm198_vm2 = vcmp.ne.s32.totalorder %v197_v2, 0  ;;  %v199_v15 = vld [vmem:[%s188_s30] sm:$0xff]  ;;  %p421_p2 = scmp.lt.s32.totalorder %s419_s23, %s413_s18 }
  0x1c   : > { %v200_v3 = vsel %vm198_vm2, 1, %v493_v0  ;;  %v349_v4 = vsel %vm198_vm2, 1.0, %v494_v1 }
  0x1d   : > { %v221_v5 = vsel %vm220_vm1, %v349_v4, 0.0  ;;  %202 = vperm.xlu0 %410, %v200_v3   ;;  %p422_p3 = por %p421_p2, %p420_p1 }
  0x1e   : > { %v222_v6 = vrot.slane %v221_v5, 4 }
  0x1f   : > { %p423_p5 = pnand %p422_p3, %p416_p0 }
  0x20   : > { %v223_v7 = vadd.f32 %v222_v6, %v221_v5 }
  0x22   : > { %v224_v8 = vrot.slane %v223_v7, 2 }
  0x24   : > { %v225_v9 = vadd.f32 %v224_v8, %v223_v7 }
  0x26   : > { %v226_v10 = vrot.slane %v225_v9, 1 }
  0x28   : > { %v227_v12 = vadd.f32 %v226_v10, %v225_v9 }
  0x2a   : > { %v228_v13 = vadd.f32 %v227_v12, %v218_v11 }
  0x2c   : > { %230 = vst.msk [vmem:[#allocation3] sm:$0x1] %vm195_vm0, %v228_v13 }
  0x33   : > { %v235_v14 = vld [vmem:[#allocation3] sm:$0x1] }
  0x34   : > { %238 = vperm.xlu0 %410, %v235_v14  }
  0x9c   : > { %v203_v16 = vpop.permute.xlu0 %202 }
  0x9d   : > { %vm204_vm5 = vcmp.eq.s32.totalorder %v203_v16, 1 }
  0x9e   : > { %v205_v17 = vsel %vm204_vm5, %v199_v15, 0.0 }
  0x9f   : > { %v208_v18 = vsel %vm207_vm4, %v205_v17, 0.0 }
  0xa0   : > { %v209_v19 = vrot.slane %v208_v18, 4 }
  0xa2   : > { %v210_v20 = vadd.f32 %v209_v19, %v208_v18 }
  0xa4   : > { %v211_v21 = vrot.slane %v210_v20, 2 }
  0xa6   : > { %v212_v22 = vadd.f32 %v211_v21, %v210_v20 }
  0xa8   : > { %v213_v23 = vrot.slane %v212_v22, 1 }
  0xaa   : > { %v214_v26 = vadd.f32 %v213_v23, %v212_v22 }
  0xac   : > { %v215_v28 = vadd.f32 %v214_v26, %v206_v25 }
  0xae   : > { %217 = vst.msk [vmem:[#allocation2] sm:$0x1] %vm193_vm3, %v215_v28 }
  0xb3   : > { %v239_v30 = vpop.permute.xlu0 %238 }
  0xb4   : > { %v244_v31 = vrot.slane %v239_v30, %v243_v29 }
  0xb5   : > { %v234_v33 = vld [vmem:[#allocation2] sm:$0x1] }
  0xb6   : > { %411 = vrcp.f32 %v244_v31 }
  0xc0   : > { %v412_v32 = vpop.eup %411 }
  0xc1   : > { %v246_v34 = vmul.f32 %v412_v32, %v234_v33 }
  0xc3   : > { %247 = vst.msk [vmem:[%s174_s5] sm:$0x1] %vm193_vm3, %v246_v34 }
  0xc4   : > { %426 = shalt.err (!%p423_p5)
}
  0xc5   : > { %s427_s24 = scalar_lea.hbm %s583_s15, 16  ;;  %s431_s27 = scalar_lea.hbm %s633_s2, 32 }
  0xc6   : > { %p428_p6 = scmp.ne.s32.totalorder %s583_s15, %s427_s24  ;;  %p432_p10 = scmp.lt.u32.totalorder %s583_s15, %s633_s2 }
  0xc7   : > { %p433_p11 = scmp.lt.u32.totalorder %s431_s27, %s427_s24  ;;  %p435_p13 = scmp.lt.u32.totalorder %s427_s24, %s583_s15 }
  0xc8   : > { %p429_p7 = pnand %p428_p6, %p551_p4 }
  0xc9   : > { %p434_p12 = por %p433_p11, %p432_p10 }
  0xca   : > { %p430_p9 = pneg %p429_p7 }
  0xcb   : > { %p436_p0 = por %p435_p13, %p434_p12 }
  0xcd   : > { %p437_p1 = pnand %p436_p0, %p430_p9 }
  0xcf   : > { %440 = shalt.err (!%p437_p1)
}
  0xd0   : > { %353 = dma.vmem_to_hbm [thread:$0]  (%p551_p4), %s585_s6, 16, %s583_s15, %s249_s16  }
  0xd1 PF: > { %p359_p2 = scmp.ge.s32.totalorder %s491_s14, 2  ;;  %s273_s30 = sand.u32 1, %s471_s9  }
  0xd2   : > { %s274_s3 = scalar_lea.sflag [#allocation5], %s273_s30 }
  0xd3   : > { %p356_p3 = pnand %p359_p2, %p558_p8 }
  0xd5   : > { %466 = dma.done.wait (!%p356_p3), %s274_s3, 16  }
  0xd6   : > { %468 = vsyncadd (!%p356_p3), %s274_s3, 4294967280  ;;  %s15_s14 = sadd.s32 1, %s491_s14   ;;  %s636_s9 = smov %s475_s10 }
  0xd7   : > { %p12_p5 = scmp.ge.s32.totalorder %s15_s14, 4   ;;  %s637_s10 = smov %s479_s11 }
  0xd8   : > { %s638_s11 = smov %s564_s22  ;;  %s639_s12 = smov %s487_s13 }
  0xd9   : > { %s640_s13 = smov %s642_s17  ;;  %14 = sbr.rel (!%p12_p5) target bundleno = 4 (0x4), region = 74 }
  0xe0   :  { %278 = vsyncpa [#allocation5], 1 }
  0xe1   :  { %280 = vsyncpa [#allocation5 + $0x1], 1 }

</bundles_post_ra>
